<compile_context>
chip_gen: v6e
topology: v6e:2x2x1
jax: 0.10.0
libtpu: 0.0.40
codegen_flags: <defaults>
</compile_context>

<pallas_src>
import numpy as np
import jax
import jax.numpy as jnp
from jax.experimental import pallas as pl
from jax.experimental.pallas import tpu as pltpu

TM_MAX = 512   # max rows of flattened output per grid step (raise to 1024+ on v5e/v6e)
LANE = 128     # lane padding for channel / reduction dims


def _pad_to(n, m):
    return ((n + m - 1) // m) * m


def _softmax_np(v):
    e = np.exp(v - np.max(v))
    return (e / e.sum()).astype(np.float32)


# ----------------------------------------------------------------------------
# Pallas kernel: one fused matmul (all conv branches + skip + bias + maxpool,
# weights/alphas/BN folded host-side) followed by the ActiBlock relu/GDN mix.
# ----------------------------------------------------------------------------
def make_darts_kernel(c_lin, c_gdn):
    c_lin = float(c_lin)   # alpha_acti[0] + alpha_acti[2]
    c_gdn = float(c_gdn)   # alpha_acti[1]

    def kernel(p_ref, w_ref, beta_ref, gammaT_ref, out_ref):
        # ConvPoolBlock: every branch arrives through the single packed patch matmul
        # (bf16 operands, f32 accumulate).
        y = jnp.dot(p_ref[...], w_ref[...], preferred_element_type=jnp.float32)
        # ActiBlock: nn.ReLU(inplace=True) mutates its input, so GDN and identity both
        # see relu(y); mix folded to out = r * ((a0+a2) + a1*sqrt(beta + gamma @ r^2)).
        r = jnp.maximum(y, 0.0)
        s = jnp.dot((r * r).astype(jnp.bfloat16), gammaT_ref[...],
                    preferred_element_type=jnp.float32) + beta_ref[...]
        # clamp s: gamma may have negative entries for real learned parameters
        out_ref[...] = (r * (c_lin + c_gdn * jnp.sqrt(jnp.maximum(s, 0.0)))).astype(out_ref.dtype)

    return kernel


# ----------------------------------------------------------------------------
# Host-side weight folding helpers (numpy, runs once at trace time)
# ----------------------------------------------------------------------------
def conv_w_to_7x7_mat(w, cin, cout):
    # Regular strided conv weight [Cout, Cin, k, k] (k in {3,5,7}, pad=(k-1)/2)
    # embedded (centered) into the shared 7x7 im2col layout -> [49*Cin, Cout].
    k = w.shape[-1]
    off = (7 - k) // 2
    m = np.zeros((7, 7, cin, cout), np.float32)
    m[off:off + k, off:off + k] = np.transpose(w, (2, 3, 1, 0))
    return m.reshape(49 * cin, cout)


# ----------------------------------------------------------------------------
# Deterministic parameter init (synthetic; shapes follow the PyTorch __init__)
# ----------------------------------------------------------------------------
def init_layer_params(rng, cin, cout):
    def w(*shape, fan):
        return (rng.standard_normal(shape) / np.sqrt(fan)).astype(np.float32)

    p = {}
    p["w7"], p["b7"] = w(cout, cin, 7, 7, fan=cin * 49), w(cout, fan=cin * 49)
    p["w3"], p["b3"] = w(cout, cin, 3, 3, fan=cin * 9), w(cout, fan=cin * 9)   # attr "conv5x5"
    p["w5"], p["b5"] = w(cout, cin, 5, 5, fan=cin * 25), w(cout, fan=cin * 25) # attr "conv3x3"
    p["wd"], p["bd"] = w(cin, 1, 3, 3, fan=9), w(cin, fan=9)                   # depthwise 3x3
    p["wp"], p["bp"] = w(cout, cin, 1, 1, fan=cin), w(cout, fan=cin)           # pointwise 1x1
    p["wsk1"] = w(cout // 2, cin, 1, 1, fan=cin)   # FactorizedReduce conv_1 (bias=False)
    p["wsk2"] = w(cout // 2, cin, 1, 1, fan=cin)   # FactorizedReduce conv_2 (bias=False)
    # BatchNorm2d(cout) eval-mode parameters / running stats
    p["bn_w"] = (1.0 + 0.01 * rng.standard_normal(cout)).astype(np.float32)
    p["bn_b"] = (0.01 * rng.standard_normal(cout)).astype(np.float32)
    p["bn_mean"] = (0.01 * rng.standard_normal(cout)).astype(np.float32)
    p["bn_var"] = (1.0 + 0.01 * np.abs(rng.standard_normal(cout))).astype(np.float32)
    n_alpha = 8 if cin == cout else 6
    p["alpha_conv"] = _softmax_np(0.001 * rng.standard_normal(n_alpha))
    p["alpha_acti"] = _softmax_np(0.001 * rng.standard_normal(3))
    p["gamma"] = (0.1 * np.eye(cout)).astype(np.float32)   # GDN gamma init
    p["beta"] = np.ones((cout,), np.float32)               # GDN beta init
    return p


# ----------------------------------------------------------------------------
# One ConvDarts layer: lightweight JAX glue + single fused pallas_call
# ----------------------------------------------------------------------------
def darts_layer(x_nhwc, p):
    N, H, W, cin = x_nhwc.shape
    cout = p["b7"].shape[0]
    assert H % 2 == 0 and W % 2 == 0, "stride-2 layers expect even spatial dims"
    OH, OW = H // 2, W // 2
    M = N * OH * OW
    CP = LANE
    has_pool = (cin == cout)                       # maxpool branch only when cin==cout
    K7 = 49 * cin
    K_used = K7 + 2 * cin + 1 + (cout if has_pool else 0)   # taps | skip | ones | maxpool
    Kp = _pad_to(K_used, LANE)

    # Tile rows so the grid has >=2-4 steps when there is enough work (2nd v7x TC +
    # pipelining); tiny layers stay single-step.
    M8 = _pad_to(M, 8)
    if M8 >= 256:
        TM = min(TM_MAX, _pad_to(max(128, M8 // 4), 8))
    else:
        TM = M8
    Mpad = _pad_to(M, TM)

    # --- glue: build the packed patch matrix DIRECTLY in bf16 --------------------
    xb = x_nhwc.astype(jnp.bfloat16)
    # shared stride-2 7x7 im2col patch (covers 7x7 / 5x5 / 3x3 / depthwise branches)
    xp = jnp.pad(xb, ((0, 0), (3, 3), (3, 3), (0, 0)))
    taps = [xp[:, ki:ki + H:2, kj:kj + W:2, :] for ki in range(7) for kj in range(7)]
    p7 = jnp.stack(taps, axis=3).reshape(M, K7)
    # FactorizedReduce skip patch: relu(x) sampled at (2oy,2ox) and (2oy+1,2ox+1)
    rx = jnp.maximum(xb, 0.0)
    psk = jnp.concatenate([rx[:, 0:H:2, 0:W:2, :], rx[:, 1:H:2, 1:W:2, :]],
                          axis=-1).reshape(M, 2 * cin)
    cols = [p7, psk, jnp.ones((M, 1), jnp.bfloat16)]     # ones column carries the bias
    if has_pool:
        # MaxPool3x3 branch (added UNscaled; AvgPool computed but never summed in the
        # reference, so it is omitted) -> enters the matmul through identity weight rows.
        mp = jax.lax.reduce_window(x_nhwc.astype(jnp.float32), -jnp.inf, jax.lax.max,
                                   (1, 3, 3, 1), (1, 2, 2, 1),
                                   ((0, 0), (1, 1), (1, 1), (0, 0)))
        cols.append(mp.reshape(M, cout).astype(jnp.bfloat16))
    P = jnp.concatenate(cols, axis=1)
    P = jnp.pad(P, ((0, Mpad - M), (0, Kp - K_used)))     # bf16, padded rows are zero

    # --- host-side weight folding (alphas, depthwise*pointwise, BN, bias, maxpool) ---
    a = p["alpha_conv"]
    a0, a1, a2, a3, a4 = [float(v) for v in a[:5]]   # only alpha[0..4] reach the output
    wp2 = p["wp"][:, :, 0, 0]                                            # [Cout, Cin]
    wd_eff = wp2[:, :, None, None] * p["wd"][:, 0][None, :, :, :]        # [Cout, Cin, 3, 3]
    wconv = (a0 * conv_w_to_7x7_mat(p["w7"], cin, cout)
             + a1 * conv_w_to_7x7_mat(p["w3"], cin, cout)
             + a2 * conv_w_to_7x7_mat(p["w5"], cin, cout)
             + a3 * conv_w_to_7x7_mat(wd_eff, cin, cout))                # [49*Cin, Cout]

    bn_scale = p["bn_w"] / np.sqrt(p["bn_var"] + 1e-5)
    bn_shift = p["bn_b"] - p["bn_mean"] * bn_scale
    half = cout // 2
    wsk = np.zeros((2 * cin, cout), np.float32)
    wsk[:cin, :half] = p["wsk1"][:, :, 0, 0].T
    wsk[cin:, half:] = p["wsk2"][:, :, 0, 0].T
    wsk = a4 * wsk * bn_scale[None, :]

    bias = (a0 * p["b7"] + a1 * p["b3"] + a2 * p["b5"]
            + a3 * (wp2 @ p["bd"] + p["bp"]) + a4 * bn_shift)

    Wfold = np.zeros((Kp, CP), np.float32)           # padded rows/cols zero -> padded out 0
    Wfold[:K7, :cout] = wconv
    Wfold[K7:K7 + 2 * cin, :cout] = wsk
    Wfold[K7 + 2 * cin, :cout] = bias
    if has_pool:
        Wfold[K7 + 2 * cin + 1:K7 + 2 * cin + 1 + cout, :cout] = np.eye(cout, dtype=np.float32)

    Wj = jnp.asarray(Wfold, jnp.bfloat16)
    betaj = jnp.asarray(np.pad(p["beta"], (0, CP - cout))[None, :], jnp.float32)
    gammaTj = jnp.asarray(np.pad(p["gamma"].T, ((0, CP - cout), (0, CP - cout))), jnp.bfloat16)

    c_acti = p["alpha_acti"]
    kernel = make_darts_kernel(c_acti[0] + c_acti[2], c_acti[1])

    row = lambda i: (i, 0)
    fix = lambda i: (0, 0)

    flops = int(2 * Mpad * CP * (Kp + CP))
    bytes_accessed = int(Mpad * Kp * 2 + Kp * CP * 2 + CP * CP * 2 + CP * 4 + Mpad * CP * 2)

    out = pl.pallas_call(
        kernel,
        out_shape=jax.ShapeDtypeStruct((Mpad, CP), jnp.bfloat16),
        grid_spec=pltpu.PrefetchScalarGridSpec(
            num_scalar_prefetch=0,
            grid=(Mpad // TM,),
            in_specs=[
                pl.BlockSpec((TM, Kp), row),    # packed patches: taps | skip | ones | maxpool
                pl.BlockSpec((Kp, CP), fix),    # folded weights (+ skip + bias + identity)
                pl.BlockSpec((1, CP), fix),     # GDN beta
                pl.BlockSpec((CP, CP), fix),    # GDN gamma^T (bf16)
            ],
            out_specs=pl.BlockSpec((TM, CP), row),
        ),
        compiler_params=pltpu.CompilerParams(
            dimension_semantics=("parallel",)),   # independent row tiles
        cost_estimate=pl.CostEstimate(flops=flops, transcendentals=int(Mpad * CP),
                                      bytes_accessed=bytes_accessed),
    )(P, Wj, betaj, gammaTj)

    return out[:M, :cout].reshape(N, OH, OW, cout)


# ----------------------------------------------------------------------------
# AnalysisTransform: l1 -> l2 -> l3 -> l4 (each halves the spatial dims)
# ----------------------------------------------------------------------------
def analysis_transform(x_nchw, layer_params):
    x = jnp.transpose(x_nchw, (0, 2, 3, 1))      # NCHW -> NHWC
    for p in layer_params:
        x = darts_layer(x, p)                    # activations carried as bf16 between layers
    return jnp.transpose(x, (0, 3, 1, 2)).astype(jnp.float32)   # NHWC -> NCHW


if __name__ == "__main__":
    num_filters, num_features = 8, 4
    rng = np.random.default_rng(0)
    chans = [(3, num_filters),
             (num_filters, num_filters),
             (num_filters, num_filters),
             (num_filters, num_features)]
    layer_params = [init_layer_params(rng, ci, co) for ci, co in chans]

    key = jax.random.PRNGKey(0)
    x = jax.random.normal(key, (2, 3, 32, 32), jnp.float32)   # NCHW image, like PyTorch

    y = analysis_transform(x, layer_params)
    y = jax.block_until_ready(y)
    assert y.shape == (2, num_features, 2, 2), y.shape
    assert bool(jnp.all(jnp.isfinite(y)))
    print("KERNEL_OK")
</pallas_src>

<mosaic_0001>
module attributes {stable_mosaic.version = 11 : i64} {
  func.func @kernel(%arg0: i32, %arg1: memref<128x256xbf16, #tpu.memory_space<vmem>>, %arg2: memref<256x128xbf16, #tpu.memory_space<vmem>>, %arg3: memref<1x128xf32, #tpu.memory_space<vmem>>, %arg4: memref<128x128xbf16, #tpu.memory_space<vmem>>, %arg5: memref<128x128xbf16, #tpu.memory_space<vmem>>) attributes {dimension_semantics = [#tpu.dimension_semantics<parallel>], iteration_bounds = array<i64: 4>, scalar_prefetch = 0 : i64, scratch_operands = 0 : i64, tpu.core_type = #tpu.core_type<tc>, window_params = [{transform_indices = @transform_0, window_bounds = array<i64: 128, 256>}, {pipeline_mode = #tpu.pipeline_mode<synchronous>, transform_indices = @transform_1, window_bounds = array<i64: 256, 128>}, {pipeline_mode = #tpu.pipeline_mode<synchronous>, transform_indices = @transform_2, window_bounds = array<i64: 1, 128>}, {pipeline_mode = #tpu.pipeline_mode<synchronous>, transform_indices = @transform_3, window_bounds = array<i64: 128, 128>}, {transform_indices = @transform_4, window_bounds = array<i64: 128, 128>}]} {
    %c0 = arith.constant 0 : index
    %c0_0 = arith.constant 0 : index
    %0 = vector.load %arg1[%c0, %c0_0] : memref<128x256xbf16, #tpu.memory_space<vmem>>, vector<128x256xbf16>
    %c0_1 = arith.constant 0 : index
    %c0_2 = arith.constant 0 : index
    %1 = vector.load %arg2[%c0_1, %c0_2] : memref<256x128xbf16, #tpu.memory_space<vmem>>, vector<256x128xbf16>
    %cst = arith.constant dense<0.000000e+00> : vector<128x128xf32>
    %2 = tpu.matmul %0, %1, %cst {dimension_numbers = #tpu.dot_dimension_numbers<[1], [0], [0], [1], [0, 0, 1, 1], [], []>} : vector<128x256xbf16>, vector<256x128xbf16>, vector<128x128xf32> -> vector<128x128xf32>
    %cst_3 = arith.constant 0.000000e+00 : f32
    %3 = vector.broadcast %cst_3 : f32 to vector<128x128xf32>
    %4 = arith.maximumf %2, %3 : vector<128x128xf32>
    %5 = arith.mulf %4, %4 : vector<128x128xf32>
    %6 = arith.truncf %5 : vector<128x128xf32> to vector<128x128xbf16>
    %c0_4 = arith.constant 0 : index
    %c0_5 = arith.constant 0 : index
    %7 = vector.load %arg4[%c0_4, %c0_5] : memref<128x128xbf16, #tpu.memory_space<vmem>>, vector<128x128xbf16>
    %cst_6 = arith.constant dense<0.000000e+00> : vector<128x128xf32>
    %8 = tpu.matmul %6, %7, %cst_6 {dimension_numbers = #tpu.dot_dimension_numbers<[1], [0], [0], [1], [0, 0, 1, 1], [], []>} : vector<128x128xbf16>, vector<128x128xbf16>, vector<128x128xf32> -> vector<128x128xf32>
    %c0_7 = arith.constant 0 : index
    %c0_8 = arith.constant 0 : index
    %9 = vector.load %arg3[%c0_7, %c0_8] : memref<1x128xf32, #tpu.memory_space<vmem>>, vector<1x128xf32>
    %10 = vector.broadcast %9 : vector<1x128xf32> to vector<128x128xf32>
    %11 = arith.addf %8, %10 : vector<128x128xf32>
    %cst_9 = arith.constant 0.000000e+00 : f32
    %12 = vector.broadcast %cst_9 : f32 to vector<128x128xf32>
    %13 = arith.maximumf %11, %12 : vector<128x128xf32>
    %14 = math.sqrt %13 : vector<128x128xf32>
    %cst_10 = arith.constant 0.333250046 : f32
    %15 = vector.broadcast %cst_10 : f32 to vector<128x128xf32>
    %16 = arith.mulf %15, %14 : vector<128x128xf32>
    %cst_11 = arith.constant 0.666749954 : f32
    %17 = vector.broadcast %cst_11 : f32 to vector<128x128xf32>
    %18 = arith.addf %17, %16 : vector<128x128xf32>
    %19 = arith.mulf %4, %18 : vector<128x128xf32>
    %20 = arith.truncf %19 : vector<128x128xf32> to vector<128x128xbf16>
    %c0_12 = arith.constant 0 : index
    %c0_13 = arith.constant 0 : index
    %21 = vector.load %arg5[%c0_12, %c0_13] : memref<128x128xbf16, #tpu.memory_space<vmem>>, vector<128x128xbf16>
    tpu.vector_store %arg5[%c0_12, %c0_13], %20 {strides = array<i32>} : memref<128x128xbf16, #tpu.memory_space<vmem>>, vector<128x128xbf16>,
    return
  }
  func.func @transform_0(%arg0: i32) -> (i32, i32) {
    %c0_i32 = arith.constant 0 : i32
    %c0_i32_0 = arith.constant 0 : i32
    return %arg0, %c0_i32 : i32, i32
  }
  func.func @transform_1(%arg0: i32) -> (i32, i32) {
    %c0_i32 = arith.constant 0 : i32
    %c0_i32_0 = arith.constant 0 : i32
    %c0_i32_1 = arith.constant 0 : i32
    return %c0_i32, %c0_i32_0 : i32, i32
  }
  func.func @transform_2(%arg0: i32) -> (i32, i32) {
    %c0_i32 = arith.constant 0 : i32
    %c0_i32_0 = arith.constant 0 : i32
    %c0_i32_1 = arith.constant 0 : i32
    return %c0_i32, %c0_i32_0 : i32, i32
  }
  func.func @transform_3(%arg0: i32) -> (i32, i32) {
    %c0_i32 = arith.constant 0 : i32
    %c0_i32_0 = arith.constant 0 : i32
    %c0_i32_1 = arith.constant 0 : i32
    return %c0_i32, %c0_i32_0 : i32, i32
  }
  func.func @transform_4(%arg0: i32) -> (i32, i32) {
    %c0_i32 = arith.constant 0 : i32
    %c0_i32_0 = arith.constant 0 : i32
    return %arg0, %c0_i32 : i32, i32
  }
}

</mosaic_0001>

<bundles_post_ra>
// kernel: tpu_custom_call.1
= control target key start
LH: loop header
LB: loop body
LE: loop exit
PB: predicated region body
PF: predicated region fallthrough
CT: control target
= control target key end

     0   :  { %9 = vsyncpa [#allocation3], 0  ;;  %s2121_s0 = inlined_call_operand.hbm [shape: bf16[512,256], index: 0, kind: input, shape index: {}]   ;;  %s2122_s1 = inlined_call_operand.hbm [shape: bf16[256,128], index: 1, kind: input, shape index: {}]   ;;  %s2123_s2 = inlined_call_operand.vmem [shape: f32[1,128], index: 2, kind: input, shape index: {}]   ;;  %s2124_s3 = inlined_call_operand.hbm [shape: bf16[128,128], index: 3, kind: input, shape index: {}]   ;;  %s2125_s4 = inlined_call_operand.hbm [shape: bf16[512,128], index: 4, kind: output, shape index: {}]  }
   0x1   :  { %11 = vsyncpa [#allocation3 + $0x1], 0 }
   0x2   :  { %12 = vsyncpa [#allocation6], 0 }
   0x3   :  { %13 = vsyncpa [#allocation4], 0 }
   0x4   :  { %15 = vsyncpa [#allocation4 + $0x1], 0  ;;  %s1732_s15 = smov 0   ;;  %s1734_s16 = smov 0  }
   0x5   :  { %s1736_s17 = smov 0   ;;  %s1738_s18 = smov 0  }
   0x6 LB: > { %s1753_s19 = sadd.s32 4294967295, %s1695_s18   ;;  %s1140_s20 = sadd.s32 4294967294, %s1695_s18   ;;  %s1695_s18 = sphi %s1738_s18, %s2146_s18   ;;  %s1691_s17 = sphi %s1736_s17, %s2145_s17   ;;  %s1687_s16 = sphi %s1734_s16, %s2144_s16   ;;  %s1683_s15 = sphi %s1732_s15, %s2143_s15  }
   0x7   : > { %p41_p0 = scmp.ne.s32.totalorder %s1687_s16, %s1683_s15  ;;  %p2126_p1 = scmp.eq.s32.totalorder %s1753_s19, 0 }
   0x8   : > { %p134_p3 = scmp.eq.s32.totalorder %s1140_s20, 3  ;;  %p1141_p5 = scmp.ge.s32.totalorder %s1695_s18, 1 }
   0x9   : > { %p1762_p4 = por %p2126_p1, %p41_p0  ;;  %p141_p7 = scmp.lt.s32.totalorder %s1695_s18, 5 }
   0xa   : > { %p1767_p6 = por %p134_p3, %p41_p0  ;;  %s1697_s24 = smov [#allocation5]  }
   0xb   : > { %s2130_s21 = scalar_select %p1762_p4, 1, 0 }
   0xc   : > { %s2131_s22 = scalar_select %p1767_p6, 1, 0 }
   0xd   : > { %p1772_p8 = pnand %p1141_p5, %p141_p7  ;;  %s153_s25 = sshll.u32 %s1697_s24, 4  ;;  %s154_s25 = int_to_ptr.vmem [resolvable:$true] %s153_s25 }
   0xe   : > { %s1698_s27 = smov [#allocation7]   ;;  %s1558_s29 = scalar_lea.vmem %s154_s25, 2048 }
   0xf   : > { %s2132_s23 = scalar_select %p1772_p8, 1, 0 }
  0x10   : > { %p1406_p9 = pneg %p1772_p8  ;;  %s169_s28 = sshll.u32 %s1698_s27, 4  ;;  %s170_s28 = int_to_ptr.vmem [resolvable:$true] %s169_s28 }
  0x11   : > { %p1559_p12 = scmp.ne.s32.totalorder %s154_s25, %s1558_s29  ;;  %p1566_p3 = scmp.lt.s32.totalorder %s154_s25, %s154_s25 }
  0x12   : > { %p1780_p10 = pnand %p1406_p9, %p2126_p1  ;;  %p1567_p5 = scmp.lt.s32.totalorder %s1558_s29, %s1558_s29 }
  0x14   : > { %p1549_p11 = pneg %p1780_p10  ;;  %p1568_p7 = por %p1567_p5, %p1566_p3 }
  0x16   : > { %p1561_p13 = pnand %p1559_p12, %p1549_p11 }
  0x18   : > { %p1562_p0 = pneg %p1561_p13 }
  0x1a   : > { %p1569_p9 = pnand %p1568_p7, %p1562_p0 }
  0x1c   : > { %1572 = shalt.err (!%p1569_p9)
}
  0x1d   : > { %s1699_s30 = smov 64   ;;  %s1700_s5 = smov 4  }
  0x1e   : > { %1409 = dma.hbm_to_vmem [thread:$0]  (!%p1780_p10), %s2122_s1, 2048, %s154_s25, [#allocation6], %s1699_s30, %s1699_s30, %s1700_s5  }
  0x1f   : > { %s1584_s8 = scalar_lea.vmem %s170_s28, 1024  ;;  %p1592_p2 = scmp.lt.s32.totalorder %s170_s28, %s170_s28 }
  0x20   : > { %p1585_p1 = scmp.ne.s32.totalorder %s170_s28, %s1584_s8  ;;  %p1593_p6 = scmp.lt.s32.totalorder %s1584_s8, %s1584_s8 }
  0x22   : > { %p1587_p12 = pnand %p1585_p1, %p1549_p11  ;;  %p1594_p3 = por %p1593_p6, %p1592_p2 }
  0x24   : > { %p1588_p13 = pneg %p1587_p12 }
  0x26   : > { %p1595_p0 = pnand %p1594_p3, %p1588_p13 }
  0x28   : > { %1598 = shalt.err (!%p1595_p0)
}
  0x29   : > { %1412 = dma.hbm_to_vmem [thread:$0]  (!%p1780_p10), %s2124_s3, 1024, %s170_s28, [#allocation6], %s1699_s30, %s1699_s30, %s1700_s5  }
  0x2a   : > { %s1803_s11 = sadd.s32 1, %s1695_s18   ;;  %s28_s12 = sadd.s32 1, %s1691_s17 }
  0x2b   : > { %s25_s13 = ssub.s32 %s1695_s18, %s1803_s11  ;;  %p35_p1 = scmp.ne.s32.totalorder %s1691_s17, %s1687_s16 }
  0x2c   : > { %p26_p2 = scmp.eq.s32.totalorder %s25_s13, 0  ;;  %p36_p6 = scmp.eq.s32.totalorder %s1695_s18, 0 }
  0x2d   : > { %p2134_p11 = scmp.eq.s32.totalorder %s1753_s19, 3  ;;  %p1423_p7 = scmp.lt.s32.totalorder %s1695_s18, 4 }
  0x2e   : > { %s1819_s20 = scalar_select %p26_p2, %s1691_s17, %s28_s12  }
  0x2f   : > { %p1813_p5 = por %p2134_p11, %p35_p1  ;;  %p37_p9 = por %p36_p6, %p35_p1 }
  0x30   : > { %s183_s24 = sand.u32 1, %s1691_s17   ;;  %s1217_s26 = sshll.u32 %s1695_s18, 11 }
  0x31   : > { %s2135_s14 = scalar_select %p1813_p5, 1, 0 }
  0x32   : > { %s1145_s25 = sshll.u32 %s183_s24, 7  ;;  %s1826_s29 = scalar_lea.hbm %s2121_s0, %s1217_s26 }
  0x33   : > { %s187_s30 = scalar_lea.vmem [#allocation2], %s1145_s25  ;;  %p1830_p10 = pnand %p1423_p7, %p37_p9 }
  0x34   : > { %s195_s5 = sshll.u32 %s187_s30, 4  ;;  %s1834_s7 = scalar_lea.sflag [#allocation3], %s183_s24  ;;  %s1828_s5 = int_to_ptr.vmem [resolvable:$true] %s195_s5 }
  0x35   : > { %s1599_s8 = scalar_lea.hbm %s1826_s29, 2048  ;;  %p1601_p13 = pneg %p1830_p10 }
  0x36   : > { %p1600_p12 = scmp.ne.s32.totalorder %s1826_s29, %s1599_s8  ;;  %s1604_s12 = scalar_lea.hbm %s2121_s0, 8192 }
  0x37   : > { %p1605_p1 = scmp.lt.s32.totalorder %s1826_s29, %s2121_s0  ;;  %p1606_p2 = scmp.lt.s32.totalorder %s1604_s12, %s1599_s8 }
  0x38   : > { %p1602_p3 = pnand %p1601_p13, %p1600_p12 }
  0x39   : > { %p1607_p6 = por %p1606_p2, %p1605_p1 }
  0x3a   : > { %p1603_p0 = pneg %p1602_p3 }
  0x3c   : > { %p1608_p11 = pnand %p1607_p6, %p1603_p0 }
  0x3e   : > { %1611 = shalt.err (!%p1608_p11)
}
  0x3f   : > { %s1612_s24 = scalar_lea.vmem %s1828_s5, 2048  ;;  %s1701_s26 = smov [#allocation2]  }
  0x40   : > { %p1613_p7 = scmp.ne.s32.totalorder %s1828_s5, %s1612_s24  ;;  %s1617_s27 = sshll.u32 %s1701_s26, 4  ;;  %s1618_s27 = int_to_ptr.vmem [resolvable:$false] %s1617_s27 }
  0x41   : > { %s1619_s28 = scalar_lea.vmem %s1618_s27, 4096  ;;  %p1620_p3 = scmp.lt.s32.totalorder %s1828_s5, %s1618_s27 }
  0x42   : > { %p1615_p9 = pnand %p1613_p7, %p1601_p13  ;;  %p1621_p5 = scmp.lt.s32.totalorder %s1619_s28, %s1612_s24 }
  0x44   : > { %p1616_p12 = pneg %p1615_p9  ;;  %p1622_p4 = por %p1621_p5, %p1620_p3 }
  0x46   : > { %p1623_p8 = pnand %p1622_p4, %p1616_p12 }
  0x48   : > { %1626 = shalt.err (!%p1623_p8)
}
  0x49   : > { %s1702_s30 = smov 128   ;;  %s1703_s8 = smov 8  }
  0x4a   : > { %1416 = dma.hbm_to_vmem [thread:$0]  (!%p1830_p10), %s1826_s29, 2048, %s1828_s5, %s1834_s7, %s1702_s30, %s1702_s30, %s1703_s8  }
  0x4b   : > { %p2137_p13 = scmp.ne.s32.totalorder %s2132_s23, 0 }
  0x4c   : > { %s1858_s9 = sand.u32 (!%p2137_p13), 1, %s1687_s16   ;;  %p2138_p4 = scmp.ne.s32.totalorder (!%p2137_p13), %s2130_s21, 0 }
  0x4d   : > { %207 = sbr.rel (%p2137_p13) target bundleno = 625 (0x271), region = 36  ;;  %s1150_s10 = sshll.u32 (!%p2137_p13), %s1858_s9, 7 }
  0x4e   : > { %s210_s12 = scalar_lea.sflag (!%p2137_p13), [#allocation3], %s1858_s9  ;;  %s1862_s13 = scalar_lea.vmem (!%p2137_p13), [#allocation2], %s1150_s10 }
  0x52   : > { %1670 = dma.done.wait (%p2138_p4), %s210_s12, 2048  }
  0x53   : > { %1672 = vsyncadd (%p2138_p4), %s210_s12, 4294965248  ;;  %p2139_p8 = scmp.eq.s32.totalorder %s1753_s19, 0 }
  0x55   : > { %1674 = dma.done.wait (%p2139_p8), [#allocation6], 3072   ;;  %p2140_p5 = pmov %p2139_p8 }
  0x56   : > { %v1467_v0 = vld [vmem:[#allocation5 + $0x78] sm:$0xff]   ;;  %v1469_v2 = vld [vmem:[#allocation5 + $0x70] sm:$0xff]   ;;  %v1471_v4 = vld [vmem:[#allocation5 + $0x68] sm:$0xff]   ;;  %s1153_s29 = sshll.u32 %s1858_s9, 6  ;;  %s1234_s6 = sshll.u32 %s1753_s19, 10 }
  0x57   : > { %1676 = vsyncadd (%p2140_p5), [#allocation6], 4294964224  ;;  %v1468_v1 = vld [vmem:[#allocation5 + $0x38] sm:$0xff]   ;;  %1282 = vmatprep.subr.bf16.mxu0 %v1467_v0  ;;  %v1470_v3 = vld [vmem:[#allocation5 + $0x30] sm:$0xff]   ;;  %s1988_s5 = scalar_lea.vmem [#allocation8], %s1153_s29  ;;  %s2075_s26 = scalar_lea.hbm %s2125_s4, %s1234_s6 }
  0x58   : > { %1283 = vmatpush3.bf16.msra.mxu0 %v1468_v1  ;;  %v1472_v5 = vld [vmem:[#allocation5 + $0x28] sm:$0xff]   ;;  %v1473_v6 = vld [vmem:[#allocation5 + $0x60] sm:$0xff]   ;;  %v1475_v8 = vld [vmem:[#allocation5 + $0x58] sm:$0xff]   ;;  %s1048_s7 = sshll.u32 %s1988_s5, 4  ;;  %s1035_s19 = scalar_lea.sflag [#allocation4], %s1858_s9  ;;  %s2077_s7 = int_to_ptr.vmem [resolvable:$true] %s1048_s7 }
  0x59   : > { %1284 = vmatprep.subr.bf16.mxu0 %v1469_v2  ;;  %v1474_v7 = vld [vmem:[#allocation5 + $0x20] sm:$0xff]   ;;  %v1476_v9 = vld [vmem:[#allocation5 + $0x18] sm:$0xff]   ;;  %v1477_v10 = vld [vmem:[#allocation5 + $0x50] sm:$0xff]   ;;  %s1627_s27 = scalar_lea.vmem %s2077_s7, 1024  ;;  %p2141_p0 = scmp.ne.s32.totalorder %s2135_s14, 0 }
  0x5a   : > { %v1485_v11 = vld [vmem:[%s1862_s13 + $0x4] ss:$8 sps:$4 sm:$0xff]   ;;  %v1478_v12 = vld [vmem:[#allocation5 + $0x10] sm:$0xff]   ;;  %v1507_v17 = vld [vmem:[#allocation7 + $0x38] sm:$0xff]   ;;  %p1628_p10 = scmp.ne.s32.totalorder %s2077_s7, %s1627_s27  ;;  %s1704_s28 = smov [#allocation8]  }
  0x5b   : > { %505 = vmatprep.mubr.bf16.mxu0 %v1485_v11  ;;  %v1479_v13 = vld [vmem:[#allocation5 + $0x48] sm:$0xff]   ;;  %v1481_v15 = vld [vmem:[#allocation5 + $0x40] sm:$0xff]   ;;  %v1508_v19 = vld [vmem:[#allocation7 + $0x30] sm:$0xff]   ;;  %1362 = vmatprep.subr.bf16.mxu1 %v1507_v17  ;;  %s1631_s30 = sshll.u32 %s1704_s28, 4  ;;  %s1632_s30 = int_to_ptr.vmem [resolvable:$false] %s1631_s30 }
  0x5c   : > { %1285 = vmatpush3.bf16.msra.mxu0 %v1470_v3  ;;  %v1480_v14 = vld [vmem:[#allocation5 + $0x8] sm:$0xff]   ;;  %v1482_v16 = vld [vmem:[#allocation5] sm:$0xff]   ;;  %v1486_v20 = vld [vmem:[%s1862_s13 + $0x14] ss:$8 sps:$4 sm:$0xff]   ;;  %1363 = vmatpush3.bf16.msra.mxu1 %v1507_v17  ;;  %p1629_p1 = pnand %p1628_p10, %p2141_p0  ;;  %s1633_s8 = scalar_lea.vmem %s1632_s30, 2048 }
  0x5d   : > { %1286 = vmatprep.subr.bf16.mxu0 %v1471_v4  ;;  %v1483_v18 = vld [vmem:[%s1862_s13] ss:$8 sps:$4 sm:$0xff]   ;;  %1364 = vmatprep.subr.bf16.mxu1 %v1508_v19  ;;  %v1488_v22 = vld [vmem:[%s1862_s13 + $0x10] ss:$8 sps:$4 sm:$0xff]   ;;  %v1489_v23 = vld [vmem:[%s1862_s13 + $0x24] ss:$8 sps:$4 sm:$0xff]   ;;  %p1634_p6 = scmp.lt.s32.totalorder %s2077_s7, %s1632_s30  ;;  %p1635_p11 = scmp.lt.s32.totalorder %s1633_s8, %s1627_s27 }
  0x5e   : > { %v1509_v21 = vld [vmem:[#allocation7 + $0x28] sm:$0xff]   ;;  %v1492_v25 = vld [vmem:[%s1862_s13 + $0x34] ss:$8 sps:$4 sm:$0xff]   ;;  %v1494_v26 = vld [vmem:[%s1862_s13 + $0x30] ss:$8 sps:$4 sm:$0xff]   ;;  %p1630_p2 = pneg %p1629_p1 }
  0x5f   : > { %v1491_v24 = vld [vmem:[%s1862_s13 + $0x20] ss:$8 sps:$4 sm:$0xff]   ;;  %v1495_v27 = vld [vmem:[%s1862_s13 + $0x44] ss:$8 sps:$4 sm:$0xff]   ;;  %v1498_v29 = vld [vmem:[%s1862_s13 + $0x54] ss:$8 sps:$4 sm:$0xff]   ;;  %p1636_p7 = por %p1635_p11, %p1634_p6 }
  0x60   : > { %1287 = vmatpush3.bf16.msra.mxu0 %v1472_v5  ;;  %1365 = vmatpush3.bf16.msra.mxu1 %v1508_v19  ;;  %v1497_v28 = vld [vmem:[%s1862_s13 + $0x40] ss:$8 sps:$4 sm:$0xff]   ;;  %v1500_v30 = vld [vmem:[%s1862_s13 + $0x50] ss:$8 sps:$4 sm:$0xff]   ;;  %v1501_v31 = vld [vmem:[%s1862_s13 + $0x64] ss:$8 sps:$4 sm:$0xff]  }
  0x61   : > { %1288 = vmatprep.subr.bf16.mxu0 %v1473_v6  ;;  %1366 = vmatprep.subr.bf16.mxu1 %v1509_v21  ;;  %v1503_v32 = vld [vmem:[%s1862_s13 + $0x60] ss:$8 sps:$4 sm:$0xff]   ;;  %v1504_v33 = vld [vmem:[%s1862_s13 + $0x74] ss:$8 sps:$4 sm:$0xff]   ;;  %v1506_v34 = vld [vmem:[%s1862_s13 + $0x70] ss:$8 sps:$4 sm:$0xff]   ;;  %p1637_p9 = pnand %p1636_p7, %p1630_p2 }
  0x62   : > { %v1510_v35 = vld [vmem:[#allocation7 + $0x20] sm:$0xff]   ;;  %v1511_v36 = vld [vmem:[#allocation7 + $0x18] sm:$0xff]   ;;  %v1512_v37 = vld [vmem:[#allocation7 + $0x10] sm:$0xff]  }
  0x63   : > { %v1513_v38 = vld [vmem:[#allocation7 + $0x8] sm:$0xff]   ;;  %v1514_v39 = vld [vmem:[#allocation7] sm:$0xff]  }
  0x64   : > { %1289 = vmatpush3.bf16.msra.mxu0 %v1474_v7  ;;  %1367 = vmatpush3.bf16.msra.mxu1 %v1509_v21 }
  0x65   : > { %1290 = vmatprep.subr.bf16.mxu0 %v1475_v8  ;;  %1368 = vmatprep.subr.bf16.mxu1 %v1510_v35 }
  0x68   : > { %1291 = vmatpush3.bf16.msra.mxu0 %v1476_v9  ;;  %1369 = vmatpush3.bf16.msra.mxu1 %v1510_v35 }
  0x69   : > { %1292 = vmatprep.subr.bf16.mxu0 %v1477_v10  ;;  %1370 = vmatprep.subr.bf16.mxu1 %v1511_v36 }
  0x6c   : > { %1293 = vmatpush3.bf16.msra.mxu0 %v1478_v12  ;;  %1371 = vmatpush3.bf16.msra.mxu1 %v1511_v36 }
  0x6d   : > { %1294 = vmatprep.subr.bf16.mxu0 %v1479_v13  ;;  %1372 = vmatprep.subr.bf16.mxu1 %v1512_v37 }
  0x70   : > { %1295 = vmatpush3.bf16.msra.mxu0 %v1480_v14  ;;  %1373 = vmatpush3.bf16.msra.mxu1 %v1512_v37 }
  0x71   : > { %1296 = vmatprep.subr.bf16.mxu0 %v1481_v15  ;;  %1374 = vmatprep.subr.bf16.mxu1 %v1513_v38 }
  0x74   : > { %1297 = vmatpush3.bf16.msra.mxu0 %v1482_v16  ;;  %1375 = vmatpush3.bf16.msra.mxu1 %v1513_v38 }
  0x75   : > { %1376 = vmatprep.subr.bf16.mxu1 %v1514_v39 }
  0x77   : > { %506 = vmatmul.mubr.bf16.vlgmr.msra.gmra.mxu0 %v1483_v18 }
  0x78   : > { %513 = vmatprep.mubr.bf16.mxu0 %v1486_v20  ;;  %1377 = vmatpush3.bf16.msra.mxu1 %v1514_v39 }
  0x7f   : > { %514 = vmatmul.mubr.bf16.gmra.mxu0 %v1488_v22 }
  0x80   : > { %521 = vmatprep.mubr.bf16.mxu0 %v1489_v23 }
  0x87   : > { %522 = vmatmul.mubr.bf16.gmra.mxu0 %v1491_v24 }
  0x88   : > { %529 = vmatprep.mubr.bf16.mxu0 %v1492_v25 }
  0x8f   : > { %530 = vmatmul.mubr.bf16.gmra.mxu0 %v1494_v26 }
  0x90   : > { %537 = vmatprep.mubr.bf16.mxu0 %v1495_v27 }
  0x97   : > { %538 = vmatmul.mubr.bf16.gmra.mxu0 %v1497_v28 }
  0x98   : > { %545 = vmatprep.mubr.bf16.mxu0 %v1498_v29 }
  0x9f   : > { %546 = vmatmul.mubr.bf16.gmra.mxu0 %v1500_v30 }
  0xa0   : > { %553 = vmatprep.mubr.bf16.mxu0 %v1501_v31 }
  0xa7   : > { %554 = vmatmul.mubr.bf16.gmra.mxu0 %v1503_v32 }
  0xa8   : > { %561 = vmatprep.mubr.bf16.mxu0 %v1504_v33 }
  0xaf   : > { %562 = vmatmul.mubr.bf16.gmra.mxu0 %v1506_v34 }
 0x137   : > { %v1298_v40 = vpop.f32.mrf.mxu0 }
 0x139   : > { %v1299_v41 = vpop.f32.mrf.mxu0 }
 0x13a   : > { %v1300_v42 = vadd.f32 %v1299_v41, %v1298_v40 }
 0x13b   : > { %v1301_v43 = vpop.f32.mrf.mxu0 }
 0x13c   : > { %v1888_v45 = vmax.f32 %v1300_v42, 0.0 }
 0x13d   : > { %v1302_v44 = vpop.f32.mrf.mxu0 }
 0x13e   : > { %v1303_v46 = vadd.f32 %v1302_v44, %v1301_v43  ;;  %v586_v51 = vmul.f32 %v1888_v45, %v1888_v45 }
 0x13f   : > { %v1304_v47 = vpop.f32.mrf.mxu0 }
 0x140   : > { %v1890_v48 = vmax.f32 %v1303_v46, 0.0 }
 0x141   : > { %v1305_v49 = vpop.f32.mrf.mxu0 }
 0x142   : > { %v1306_v50 = vadd.f32 %v1305_v49, %v1304_v47  ;;  %v587_v52 = vmul.f32 %v1890_v48, %v1890_v48 }
 0x143   : > { %v1307_v53 = vpop.f32.mrf.mxu0 }
 0x144   : > { %v602_v54 = vpack.c.bf16 %v587_v52, %v586_v51  ;;  %v1896_v56 = vmax.f32 %v1306_v50, 0.0 }
 0x145   : > { %v1308_v55 = vpop.f32.mrf.mxu0 }
 0x146   : > { %v1309_v57 = vadd.f32 %v1308_v55, %v1307_v53  ;;  %1378 = vmatprep.mubr.bf16.mxu1 %v602_v54  ;;  %v588_v61 = vmul.f32 %v1896_v56, %v1896_v56 }
 0x147   : > { %v1310_v58 = vpop.f32.mrf.mxu0 }
 0x148   : > { %v1898_v59 = vmax.f32 %v1309_v57, 0.0 }
 0x149   : > { %v1311_v60 = vpop.f32.mrf.mxu0 }
 0x14a   : > { %v589_v62 = vmul.f32 %v1898_v59, %v1898_v59  ;;  %v1312_v63 = vadd.f32 %v1311_v60, %v1310_v58 }
 0x14b   : > { %v1313_v0 = vpop.f32.mrf.mxu0 }
 0x14c   : > { %v603_v1 = vpack.c.bf16 %v589_v62, %v588_v61  ;;  %v1904_v3 = vmax.f32 %v1312_v63, 0.0 }
 0x14d   : > { %v1314_v2 = vpop.f32.mrf.mxu0 }
 0x14e   : > { %v1315_v4 = vadd.f32 %v1314_v2, %v1313_v0  ;;  %1379 = vmatmul.mubr.bf16.vlgmr.msra.gmra.mxu1 %v603_v1  ;;  %v590_v8 = vmul.f32 %v1904_v3, %v1904_v3 }
 0x14f   : > { %v1316_v5 = vpop.f32.mrf.mxu0 }
 0x150   : > { %v1906_v6 = vmax.f32 %v1315_v4, 0.0 }
 0x151   : > { %v1317_v7 = vpop.f32.mrf.mxu0 }
 0x152   : > { %v591_v9 = vmul.f32 %v1906_v6, %v1906_v6  ;;  %v1318_v10 = vadd.f32 %v1317_v7, %v1316_v5  ;;  %v1955_v5 = vld [vmem:[%s2123_s2] ss:$0 sm:$0xff] }
 0x153   : > { %v1319_v11 = vpop.f32.mrf.mxu0 }
 0x154   : > { %v604_v12 = vpack.c.bf16 %v591_v9, %v590_v8  ;;  %v1912_v14 = vmax.f32 %v1318_v10, 0.0 }
 0x155   : > { %v1320_v13 = vpop.f32.mrf.mxu0 }
 0x156   : > { %v1321_v15 = vadd.f32 %v1320_v13, %v1319_v11  ;;  %1382 = vmatprep.mubr.bf16.mxu1 %v604_v12  ;;  %v592_v19 = vmul.f32 %v1912_v14, %v1912_v14 }
 0x157   : > { %v1322_v16 = vpop.f32.mrf.mxu0 }
 0x158   : > { %v1914_v17 = vmax.f32 %v1321_v15, 0.0 }
 0x159   : > { %v1323_v18 = vpop.f32.mrf.mxu0 }
 0x15a   : > { %v593_v20 = vmul.f32 %v1914_v17, %v1914_v17  ;;  %v1324_v21 = vadd.f32 %v1323_v18, %v1322_v16 }
 0x15b   : > { %v1325_v22 = vpop.f32.mrf.mxu0 }
 0x15c   : > { %v605_v23 = vpack.c.bf16 %v593_v20, %v592_v19  ;;  %v1920_v25 = vmax.f32 %v1324_v21, 0.0 }
 0x15d   : > { %v1326_v24 = vpop.f32.mrf.mxu0 }
 0x15e   : > { %v1327_v26 = vadd.f32 %v1326_v24, %v1325_v22  ;;  %1383 = vmatmul.mubr.bf16.gmra.mxu1 %v605_v23  ;;  %v594_v30 = vmul.f32 %v1920_v25, %v1920_v25 }
 0x15f   : > { %v1328_v27 = vpop.f32.mrf.mxu0 }
 0x160   : > { %v1922_v28 = vmax.f32 %v1327_v26, 0.0 }
 0x161   : > { %v1329_v29 = vpop.f32.mrf.mxu0 }
 0x162   : > { %v595_v31 = vmul.f32 %v1922_v28, %v1922_v28  ;;  %v1330_v32 = vadd.f32 %v1329_v29, %v1328_v27 }
 0x163   : > { %v1331_v33 = vpop.f32.mrf.mxu0 }
 0x164   : > { %v606_v34 = vpack.c.bf16 %v595_v31, %v594_v30  ;;  %v1928_v36 = vmax.f32 %v1330_v32, 0.0 }
 0x165   : > { %v1332_v35 = vpop.f32.mrf.mxu0 }
 0x166   : > { %v1333_v37 = vadd.f32 %v1332_v35, %v1331_v33  ;;  %1386 = vmatprep.mubr.bf16.mxu1 %v606_v34  ;;  %v596_v41 = vmul.f32 %v1928_v36, %v1928_v36 }
 0x167   : > { %v1334_v38 = vpop.f32.mrf.mxu0 }
 0x168   : > { %v1930_v39 = vmax.f32 %v1333_v37, 0.0 }
 0x169   : > { %v1335_v40 = vpop.f32.mrf.mxu0 }
 0x16a   : > { %v597_v42 = vmul.f32 %v1930_v39, %v1930_v39  ;;  %v1336_v43 = vadd.f32 %v1335_v40, %v1334_v38 }
 0x16b   : > { %v1337_v44 = vpop.f32.mrf.mxu0 }
 0x16c   : > { %v607_v46 = vpack.c.bf16 %v597_v42, %v596_v41  ;;  %v1936_v49 = vmax.f32 %v1336_v43, 0.0 }
 0x16d   : > { %v1338_v47 = vpop.f32.mrf.mxu0 }
 0x16e   : > { %v1339_v50 = vadd.f32 %v1338_v47, %v1337_v44  ;;  %1387 = vmatmul.mubr.bf16.gmra.mxu1 %v607_v46  ;;  %v598_v54 = vmul.f32 %v1936_v49, %v1936_v49 }
 0x16f   : > { %v1340_v51 = vpop.f32.mrf.mxu0 }
 0x170   : > { %v1938_v52 = vmax.f32 %v1339_v50, 0.0 }
 0x171   : > { %v1341_v53 = vpop.f32.mrf.mxu0 }
 0x172   : > { %v599_v55 = vmul.f32 %v1938_v52, %v1938_v52  ;;  %v1342_v57 = vadd.f32 %v1341_v53, %v1340_v51 }
 0x173   : > { %v1343_v58 = vpop.f32.mrf.mxu0 }
 0x174   : > { %v608_v60 = vpack.c.bf16 %v599_v55, %v598_v54  ;;  %v1944_v62 = vmax.f32 %v1342_v57, 0.0 }
 0x175   : > { %v1344_v61 = vpop.f32.mrf.mxu0 }
 0x176   : > { %v1345_v63 = vadd.f32 %v1344_v61, %v1343_v58  ;;  %1390 = vmatprep.mubr.bf16.mxu1 %v608_v60  ;;  %v600_v1 = vmul.f32 %v1944_v62, %v1944_v62 }
 0x178   : > { %v1946_v0 = vmax.f32 %v1345_v63, 0.0 }
 0x17a   : > { %v601_v2 = vmul.f32 %v1946_v0, %v1946_v0 }
 0x17c   : > { %v609_v4 = vpack.c.bf16 %v601_v2, %v600_v1 }
 0x17e   : > { %1391 = vmatmul.mubr.bf16.gmra.mxu1 %v609_v4 }
 0x20e   : > { %v1380_v7 = vpop.f32.mrf.mxu1 }
 0x20f   : > { %v724_v8 = vadd.f32 %v1380_v7, %v1955_v5 }
 0x210   : > { %v715_v9 = vpop.f32.mrf.mxu1 }
 0x211   : > { %v780_v10 = vmax.f32 %v724_v8, 0.0  ;;  %v716_v11 = vadd.f32 %v1955_v5, %v715_v9 }
 0x212   : > { %v1381_v12 = vpop.f32.mrf.mxu1 }
 0x213   : > { %1515 = vrsqrt.f32 %v780_v10  ;;  %v778_v13 = vmax.f32 %v716_v11, 0.0  ;;  %v727_v15 = vadd.f32 %v1381_v12, %v1955_v5  ;;  %vm810_vm0 = vcmp.eq.f32.partialorder %v780_v10, inf }
 0x214   : > { %v718_v16 = vpop.f32.mrf.mxu1  ;;  %v813_v30 = vand.u32 2147483648, %v780_v10  ;;  %vm812_vm1 = vcmp.eq.f32.partialorder %v780_v10, 0.0 }
 0x215   : > { %v719_v18 = vadd.f32 %v1955_v5, %v718_v16  ;;  %1517 = vrsqrt.f32 %v778_v13  ;;  %v781_v19 = vmax.f32 %v727_v15, 0.0  ;;  %vm796_vm2 = vcmp.eq.f32.partialorder %v778_v13, inf }
 0x216   : > { %v799_v40 = vand.u32 2147483648, %v778_v13  ;;  %vm798_vm3 = vcmp.eq.f32.partialorder %v778_v13, 0.0 }
 0x217   : > { %v779_v20 = vmax.f32 %v719_v18, 0.0  ;;  %1519 = vrsqrt.f32 %v781_v19  ;;  %vm817_vm4 = vcmp.eq.f32.partialorder %v781_v19, inf  ;;  %v820_v53 = vand.u32 2147483648, %v781_v19 }
 0x218   : > { %vm819_vm5 = vcmp.eq.f32.partialorder %v781_v19, 0.0 }
 0x219   : > { %1521 = vrsqrt.f32 %v779_v20  ;;  %vm803_vm6 = vcmp.eq.f32.partialorder %v779_v20, inf  ;;  %v806_v61 = vand.u32 2147483648, %v779_v20  ;;  %vm805_vm7 = vcmp.eq.f32.partialorder %v779_v20, 0.0 }
 0x21e   : > { %v1384_v21 = vpop.f32.mrf.mxu1 }
 0x21f   : > { %v740_v22 = vadd.f32 %v1384_v21, %v1955_v5 }
 0x220   : > { %v1516_v23 = vpop.eup %1515  ;;  %v731_v24 = vpop.f32.mrf.mxu1 }
 0x221   : > { %v809_v26 = vmul.f32 %v1516_v23, %v780_v10  ;;  %v1962_v27 = vmax.f32 %v740_v22, 0.0  ;;  %v732_v29 = vadd.f32 %v1955_v5, %v731_v24 }
 0x222   : > { %v1385_v31 = vpop.f32.mrf.mxu1  ;;  %v1518_v32 = vpop.eup %1517 }
 0x223   : > { %v811_v33 = vsel %vm810_vm0, %v780_v10, %v809_v26  ;;  %1523 = vrsqrt.f32 %v1962_v27  ;;  %v795_v35 = vmul.f32 %v1518_v32, %v778_v13  ;;  %v1966_v37 = vmax.f32 %v732_v29, 0.0 }
 0x224   : > { %v814_v34 = vsel %vm812_vm1, %v813_v30, %v811_v33  ;;  %v734_v38 = vpop.f32.mrf.mxu1  ;;  %v743_v41 = vadd.f32 %v1385_v31, %v1955_v5  ;;  %v1520_v43 = vpop.eup %1519  ;;  %vm838_vm8 = vcmp.eq.f32.partialorder %v1962_v27, inf  ;;  %vm840_vm9 = vcmp.eq.f32.partialorder %v1962_v27, 0.0 }
 0x225   : > { %v735_v42 = vadd.f32 %v1955_v5, %v734_v38  ;;  %v797_v44 = vsel %vm796_vm2, %v778_v13, %v795_v35  ;;  %1525 = vrsqrt.f32 %v1966_v37  ;;  %v908_v47 = vmul.f32 0.33325005, %v814_v34 }
 0x226   : > { %v1522_v46 = vpop.eup %1521  ;;  %v800_v50 = vsel %vm798_vm3, %v799_v40, %v797_v44  ;;  %v816_v51 = vmul.f32 %v1520_v43, %v781_v19  ;;  %v1971_v57 = vmax.f32 %v743_v41, 0.0  ;;  %vm824_vm10 = vcmp.eq.f32.partialorder %v1966_v37, inf }
 0x227   : > { %v906_v54 = vmul.f32 0.33325005, %v800_v50  ;;  %v802_v55 = vmul.f32 %v1522_v46, %v779_v20  ;;  %v1973_v58 = vmax.f32 %v735_v42, 0.0  ;;  %v924_v2 = vadd.f32 0.66674995, %v908_v47 }
 0x228   : > { %v818_v60 = vsel %vm817_vm4, %v781_v19, %v816_v51  ;;  %1527 = vrsqrt.f32 %v1971_v57  ;;  %v827_v34 = vand.u32 2147483648, %v1966_v37  ;;  %vm826_vm11 = vcmp.eq.f32.partialorder %v1966_v37, 0.0 }
 0x229   : > { %v821_v63 = vsel %vm819_vm5, %v820_v53, %v818_v60  ;;  %v804_v1 = vsel %vm803_vm6, %v779_v20, %v802_v55  ;;  %v922_v8 = vadd.f32 0.66674995, %v906_v54  ;;  %1529 = vrsqrt.f32 %v1973_v58 }
 0x22a   : > { %v909_v4 = vmul.f32 0.33325005, %v821_v63  ;;  %v807_v7 = vsel %vm805_vm7, %v806_v61, %v804_v1  ;;  %v940_v13 = vmul.f32 %v924_v2, %v1896_v56  ;;  %vm845_vm12 = vcmp.eq.f32.partialorder %v1971_v57, inf }
 0x22b   : > { %v907_v9 = vmul.f32 0.33325005, %v807_v7  ;;  %v938_v19 = vmul.f32 %v922_v8, %v1888_v45  ;;  %v848_v50 = vand.u32 2147483648, %v1971_v57  ;;  %vm847_vm13 = vcmp.eq.f32.partialorder %v1971_v57, 0.0 }
 0x22c   : > { %v925_v10 = vadd.f32 0.66674995, %v909_v4  ;;  %vm831_vm14 = vcmp.eq.f32.partialorder %v1973_v58, inf  ;;  %v834_v55 = vand.u32 2147483648, %v1973_v58  ;;  %vm833_vm15 = vcmp.eq.f32.partialorder %v1973_v58, 0.0 }
 0x22d   : > { %v923_v11 = vadd.f32 0.66674995, %v907_v9 }
 0x22e   : > { %v1388_v12 = vpop.f32.mrf.mxu1  ;;  %v941_v15 = vmul.f32 %v925_v10, %v1898_v59 }
 0x22f   : > { %v756_v16 = vadd.f32 %v1388_v12, %v1955_v5  ;;  %v939_v20 = vmul.f32 %v923_v11, %v1890_v48  ;;  %v841_v48 = vand.u32 2147483648, %v1962_v27 }
 0x230   : > { %v1524_v18 = vpop.eup %1523  ;;  %v747_v21 = vpop.f32.mrf.mxu1  ;;  %v1243_v22 = vpack.c.bf16 %v941_v15, %v940_v13 }
 0x231   : > { %v837_v23 = vmul.f32 %v1524_v18, %v1962_v27  ;;  %v1984_v24 = vmax.f32 %v756_v16, 0.0  ;;  %v748_v26 = vadd.f32 %v1955_v5, %v747_v21  ;;  %v1238_v29 = vpack.c.bf16 %v939_v20, %v938_v19 }
 0x232   : > { %v1389_v56 = vpop.f32.mrf.mxu1  ;;  %v1526_v59 = vpop.eup %1525  ;;  %1275 = vst [vmem:[%s1988_s5 + $0x8] sm:$0xff] %v1243_v22  }
 0x233   : > { %v839_v45 = vsel %vm838_vm8, %v1962_v27, %v837_v23  ;;  %1531 = vrsqrt.f32 %v1984_v24  ;;  %1239 = vst [vmem:[%s1988_s5] sm:$0xff] %v1238_v29   ;;  %v823_v30 = vmul.f32 %v1526_v59, %v1966_v37  ;;  %v1998_v31 = vmax.f32 %v748_v26, 0.0 }
 0x234   : > { %v750_v32 = vpop.f32.mrf.mxu1  ;;  %v842_v33 = vsel %vm840_vm9, %v841_v48, %v839_v45  ;;  %v759_v35 = vadd.f32 %v1389_v56, %v1955_v5  ;;  %vm866_vm0 = vcmp.eq.f32.partialorder %v1984_v24, inf  ;;  %vm868_vm1 = vcmp.eq.f32.partialorder %v1984_v24, 0.0 }
 0x235   : > { %v751_v38 = vadd.f32 %v1955_v5, %v750_v32  ;;  %v825_v40 = vsel %vm824_vm10, %v1966_v37, %v823_v30  ;;  %1533 = vrsqrt.f32 %v1998_v31  ;;  %v1528_v27 = vpop.eup %1527  ;;  %v912_v43 = vmul.f32 0.33325005, %v842_v33 }
 0x236   : > { %v828_v41 = vsel %vm826_vm11, %v827_v34, %v825_v40  ;;  %v2006_v42 = vmax.f32 %v759_v35, 0.0  ;;  %v844_v44 = vmul.f32 %v1528_v27, %v1971_v57  ;;  %v1530_v47 = vpop.eup %1529  ;;  %vm852_vm2 = vcmp.eq.f32.partialorder %v1998_v31, inf }
 0x237   : > { %v2009_v46 = vmax.f32 %v751_v38, 0.0  ;;  %v910_v51 = vmul.f32 0.33325005, %v828_v41  ;;  %v830_v53 = vmul.f32 %v1530_v47, %v1973_v58  ;;  %v928_v60 = vadd.f32 0.66674995, %v912_v43 }
 0x238   : > { %1535 = vrsqrt.f32 %v2006_v42  ;;  %v846_v37 = vsel %vm845_vm12, %v1971_v57, %v844_v44  ;;  %vm854_vm3 = vcmp.eq.f32.partialorder %v1998_v31, 0.0  ;;  %vm873_vm4 = vcmp.eq.f32.partialorder %v2006_v42, inf }
 0x239   : > { %v849_v54 = vsel %vm847_vm13, %v848_v50, %v846_v37  ;;  %1537 = vrsqrt.f32 %v2009_v46  ;;  %v832_v63 = vsel %vm831_vm14, %v1973_v58, %v830_v53  ;;  %v926_v2 = vadd.f32 0.66674995, %v910_v51 }
 0x23a   : > { %v913_v61 = vmul.f32 0.33325005, %v849_v54  ;;  %v835_v1 = vsel %vm833_vm15, %v834_v55, %v832_v63  ;;  %v944_v10 = vmul.f32 %v928_v60, %v1912_v14  ;;  %v869_v14 = vand.u32 2147483648, %v1984_v24 }
 0x23b   : > { %v911_v7 = vmul.f32 0.33325005, %v835_v1  ;;  %v942_v18 = vmul.f32 %v926_v2, %v1904_v3  ;;  %vm875_vm5 = vcmp.eq.f32.partialorder %v2006_v42, 0.0  ;;  %v876_v35 = vand.u32 2147483648, %v2006_v42 }
 0x23c   : > { %v929_v4 = vadd.f32 0.66674995, %v913_v61  ;;  %vm859_vm6 = vcmp.eq.f32.partialorder %v2009_v46, inf  ;;  %vm861_vm7 = vcmp.eq.f32.partialorder %v2009_v46, 0.0  ;;  %v862_v41 = vand.u32 2147483648, %v2009_v46 }
 0x23d   : > { %v927_v12 = vadd.f32 0.66674995, %v911_v7 }
 0x23e   : > { %v1392_v57 = vpop.f32.mrf.mxu1  ;;  %v945_v11 = vmul.f32 %v929_v4, %v1914_v17 }
 0x23f   : > { %v772_v8 = vadd.f32 %v1392_v57, %v1955_v5  ;;  %v943_v20 = vmul.f32 %v927_v12, %v1906_v6  ;;  %v855_v6 = vand.u32 2147483648, %v1998_v31 }
 0x240   : > { %v1532_v9 = vpop.eup %1531  ;;  %v763_v13 = vpop.f32.mrf.mxu1  ;;  %v1253_v19 = vpack.c.bf16 %v945_v11, %v944_v10 }
 0x241   : > { %v865_v15 = vmul.f32 %v1532_v9, %v1984_v24  ;;  %v2027_v58 = vmax.f32 %v772_v8, 0.0  ;;  %v764_v16 = vadd.f32 %v1955_v5, %v763_v13  ;;  %v1248_v23 = vpack.c.bf16 %v943_v20, %v942_v18 }
 0x242   : > { %v1393_v17 = vpop.f32.mrf.mxu1  ;;  %v1534_v21 = vpop.eup %1533  ;;  %1277 = vst [vmem:[%s1988_s5 + $0x18] sm:$0xff] %v1253_v19  }
 0x243   : > { %v867_v22 = vsel %vm866_vm0, %v1984_v24, %v865_v15  ;;  %1539 = vrsqrt.f32 %v2027_v58  ;;  %v851_v29 = vmul.f32 %v1534_v21, %v1998_v31  ;;  %v790_v56 = vmax.f32 %v764_v16, 0.0  ;;  %1276 = vst [vmem:[%s1988_s5 + $0x10] sm:$0xff] %v1248_v23  }
 0x244   : > { %v870_v26 = vsel %vm868_vm1, %v869_v14, %v867_v22  ;;  %v766_v3 = vpop.f32.mrf.mxu1  ;;  %v775_v59 = vadd.f32 %v1393_v17, %v1955_v5  ;;  %vm894_vm8 = vcmp.eq.f32.partialorder %v2027_v58, inf  ;;  %vm896_vm9 = vcmp.eq.f32.partialorder %v2027_v58, 0.0 }
 0x245   : > { %v1536_v45 = vpop.eup %1535  ;;  %v853_v48 = vsel %vm852_vm2, %v1998_v31, %v851_v29  ;;  %v767_v24 = vadd.f32 %v1955_v5, %v766_v3  ;;  %v916_v30 = vmul.f32 0.33325005, %v870_v26  ;;  %1541 = vrsqrt.f32 %v790_v56 }
 0x246   : > { %v856_v32 = vsel %vm854_vm3, %v855_v6, %v853_v48  ;;  %v872_v33 = vmul.f32 %v1536_v45, %v2006_v42  ;;  %v1538_v34 = vpop.eup %1537  ;;  %v793_v5 = vmax.f32 %v775_v59, 0.0  ;;  %vm880_vm10 = vcmp.eq.f32.partialorder %v790_v56, inf }
 0x247   : > { %v914_v38 = vmul.f32 0.33325005, %v856_v32  ;;  %v858_v31 = vmul.f32 %v1538_v34, %v2009_v46  ;;  %v791_v43 = vmax.f32 %v767_v24, 0.0  ;;  %v932_v44 = vadd.f32 0.66674995, %v916_v30 }
 0x248   : > { %v874_v40 = vsel %vm873_vm4, %v2006_v42, %v872_v33  ;;  %1543 = vrsqrt.f32 %v793_v5  ;;  %vm882_vm11 = vcmp.eq.f32.partialorder %v790_v56, 0.0  ;;  %vm901_vm12 = vcmp.eq.f32.partialorder %v793_v5, inf }
 0x249   : > { %v877_v27 = vsel %vm875_vm5, %v876_v35, %v874_v40  ;;  %v860_v50 = vsel %vm859_vm6, %v2009_v46, %v858_v31  ;;  %v930_v37 = vadd.f32 0.66674995, %v914_v38  ;;  %1545 = vrsqrt.f32 %v791_v43 }
 0x24a   : > { %v917_v47 = vmul.f32 0.33325005, %v877_v27  ;;  %v863_v51 = vsel %vm861_vm7, %v862_v41, %v860_v50  ;;  %v948_v42 = vmul.f32 %v932_v44, %v1928_v36  ;;  %v897_v36 = vand.u32 2147483648, %v2027_v58 }
 0x24b   : > { %v915_v54 = vmul.f32 0.33325005, %v863_v51  ;;  %v946_v63 = vmul.f32 %v930_v37, %v1920_v25  ;;  %v883_v25 = vand.u32 2147483648, %v790_v56  ;;  %v904_v15 = vand.u32 2147483648, %v793_v5 }
 0x24c   : > { %v933_v53 = vadd.f32 0.66674995, %v917_v47  ;;  %vm903_vm13 = vcmp.eq.f32.partialorder %v793_v5, 0.0  ;;  %vm887_vm14 = vcmp.eq.f32.partialorder %v791_v43, inf  ;;  %v890_v20 = vand.u32 2147483648, %v791_v43 }
 0x24d   : > { %v931_v60 = vadd.f32 0.66674995, %v915_v54  ;;  %vm889_vm15 = vcmp.eq.f32.partialorder %v791_v43, 0.0 }
 0x24e   : > { %v949_v55 = vmul.f32 %v933_v53, %v1930_v39 }
 0x24f   : > { %v947_v2 = vmul.f32 %v931_v60, %v1922_v28 }
 0x250   : > { %v1540_v61 = vpop.eup %1539  ;;  %v1263_v1 = vpack.c.bf16 %v949_v55, %v948_v42 }
 0x251   : > { %v893_v46 = vmul.f32 %v1540_v61, %v2027_v58  ;;  %v1258_v4 = vpack.c.bf16 %v947_v2, %v946_v63 }
 0x252   : > { %1279 = vst [vmem:[%s1988_s5 + $0x28] sm:$0xff] %v1263_v1   ;;  %v1542_v57 = vpop.eup %1541 }
 0x253   : > { %v895_v7 = vsel %vm894_vm8, %v2027_v58, %v893_v46  ;;  %1278 = vst [vmem:[%s1988_s5 + $0x20] sm:$0xff] %v1258_v4   ;;  %v879_v39 = vmul.f32 %v1542_v57, %v790_v56 }
 0x254   : > { %v898_v8 = vsel %vm896_vm9, %v897_v36, %v895_v7 }
 0x255   : > { %v881_v9 = vsel %vm880_vm10, %v790_v56, %v879_v39  ;;  %v1544_v28 = vpop.eup %1543  ;;  %v920_v11 = vmul.f32 0.33325005, %v898_v8 }
 0x256   : > { %v884_v10 = vsel %vm882_vm11, %v883_v25, %v881_v9  ;;  %v900_v12 = vmul.f32 %v1544_v28, %v793_v5  ;;  %v1546_v13 = vpop.eup %1545 }
 0x257   : > { %v918_v16 = vmul.f32 0.33325005, %v884_v10  ;;  %v886_v19 = vmul.f32 %v1546_v13, %v791_v43  ;;  %v936_v14 = vadd.f32 0.66674995, %v920_v11 }
 0x258   : > { %v902_v18 = vsel %vm901_vm12, %v793_v5, %v900_v12 }
 0x259   : > { %v905_v58 = vsel %vm903_vm13, %v904_v15, %v902_v18  ;;  %v888_v21 = vsel %vm887_vm14, %v791_v43, %v886_v19  ;;  %v934_v23 = vadd.f32 0.66674995, %v918_v16  ;;  %v952_v3 = vmul.f32 %v936_v14, %v1944_v62 }
 0x25a   : > { %v921_v17 = vmul.f32 0.33325005, %v905_v58  ;;  %v891_v22 = vsel %vm889_vm15, %v890_v20, %v888_v21 }
 0x25b   : > { %v919_v29 = vmul.f32 0.33325005, %v891_v22  ;;  %v950_v59 = vmul.f32 %v934_v23, %v1936_v49 }
 0x25c   : > { %v937_v26 = vadd.f32 0.66674995, %v921_v17 }
 0x25d   : > { %v935_v56 = vadd.f32 0.66674995, %v919_v29 }
 0x25e   : > { %v953_v6 = vmul.f32 %v937_v26, %v1946_v0 }
 0x25f   : > { %v951_v48 = vmul.f32 %v935_v56, %v1938_v52 }
 0x260   : > { %v1273_v45 = vpack.c.bf16 %v953_v6, %v952_v3 }
 0x261   : > { %v1268_v62 = vpack.c.bf16 %v951_v48, %v950_v59 }
 0x262   : > { %1281 = vst [vmem:[%s1988_s5 + $0x38] sm:$0xff] %v1273_v45  }
 0x263   : > { %1280 = vst [vmem:[%s1988_s5 + $0x30] sm:$0xff] %v1268_v62  }
 0x264   : > { %1640 = shalt.err (!%p1637_p9)
}
 0x265   : > { %s1641_s10 = scalar_lea.hbm %s2075_s26, 1024  ;;  %s1645_s21 = scalar_lea.hbm %s2125_s4, 4096 }
 0x266   : > { %p1642_p12 = scmp.ne.s32.totalorder %s2075_s26, %s1641_s10  ;;  %p1646_p4 = scmp.lt.s32.totalorder %s2075_s26, %s2125_s4 }
 0x267   : > { %p1647_p8 = scmp.lt.s32.totalorder %s1645_s21, %s1641_s10 }
 0x268   : > { %p1643_p3 = pnand %p1642_p12, %p2141_p0 }
 0x269   : > { %p1648_p5 = por %p1647_p8, %p1646_p4 }
 0x26a   : > { %p1644_p13 = pneg %p1643_p3 }
 0x26c   : > { %p1649_p10 = pnand %p1648_p5, %p1644_p13 }
 0x26e   : > { %1652 = shalt.err (!%p1649_p10)
}
 0x26f   : > { %s1705_s5 = smov 64   ;;  %s1706_s6 = smov 4  }
 0x270   : > { %1404 = dma.vmem_to_hbm [thread:$0]  (%p2141_p0), %s2077_s7, 1024, %s2075_s26, %s1035_s19, %s1705_s5, %s1705_s5, %s1706_s6  }
 0x271 PF: > { %p1426_p1 = scmp.ge.s32.totalorder %s1695_s18, 2  ;;  %s1063_s25 = sand.u32 1, %s1683_s15  }
 0x272   : > { %p2142_p2 = scmp.ne.s32.totalorder %s2131_s22, 0  ;;  %s1064_s24 = scalar_lea.sflag [#allocation4], %s1063_s25 }
 0x274   : > { %p1418_p6 = pnand %p1426_p1, %p2142_p2 }
 0x276   : > { %p1419_p11 = pneg %p1418_p6 }
 0x278   : > { %1678 = dma.done.wait (%p1419_p11), %s1064_s24, 1024  }
 0x279   : > { %1680 = vsyncadd (%p1419_p11), %s1064_s24, 4294966272  ;;  %p18_p7 = scmp.ge.s32.totalorder %s1803_s11, 6   ;;  %s2143_s15 = smov %s1687_s16 }
 0x27a   : > { %s2144_s16 = smov %s1691_s17  ;;  %s2145_s17 = smov %s1819_s20 }
 0x27b   : > { %s2146_s18 = smov %s1803_s11  ;;  %20 = sbr.rel (!%p18_p7) target bundleno = 6 (0x6), region = 89 }
 0x280   :  { %1069 = vsyncpa [#allocation3], 1 }
 0x281   :  { %1071 = vsyncpa [#allocation3 + $0x1], 1 }
 0x282   :  { %1072 = vsyncpa [#allocation6], 1 }
 0x283   :  { %1073 = vsyncpa [#allocation4], 1 }
 0x284   :  { %1075 = vsyncpa [#allocation4 + $0x1], 1 }

</bundles_post_ra>
